<compile_context>
chip_gen: v7x
topology: tpu7x:2x2x1
jax: 0.10.0
libtpu: 0.0.40
codegen_flags: <defaults>
</compile_context>

<pallas_src>
import functools

import jax
import jax.numpy as jnp
from jax.experimental import pallas as pl
from jax.experimental.pallas import tpu as pltpu


def _stable_softplus(x):
    # softplus(x) = max(x, 0) + log1p(exp(-|x|))  -- no overflow for large x.
    return jnp.maximum(x, 0.0) + jnp.log1p(jnp.exp(-jnp.abs(x)))


def _round_up(v, m):
    return ((v + m - 1) // m) * m


def _bayes_linear_kernel(x_ref, wmu_ref, wsig_ref, weps_ref,
                         bmu_ref, bsig_ref, beps_ref,
                         o_ref, acc_ref, *, s_blk, tk, x_resident, mm_dtype):
    k = pl.program_id(3)
    k_tiles = pl.num_programs(3)

    @pl.when(k == 0)
    def _():
        acc_ref[...] = jnp.zeros_like(acc_ref)

    # x: resident per m-tile (block (tm, k_pad)); slice the current k chunk in-kernel.
    if x_resident:
        x_chunk = x_ref[:, pl.ds(k * tk, tk)]
    else:
        x_chunk = x_ref[...]
    x_chunk = x_chunk.astype(mm_dtype)

    wmu = wmu_ref[...]          # (tn, tk) -- shared across the whole sample block
    wsig = wsig_ref[...]        # (tn, tk)

    # Statically unrolled loop over the S_BLK samples in this block: the sampled W
    # is just mu + sigma*eps (softplus already hoisted to the wrapper), contracted
    # against x on the MXU with no materialized transpose.
    for s in range(s_blk):
        w = (wmu + wsig * weps_ref[s]).astype(mm_dtype)               # (tn, tk)
        acc_ref[s] += jax.lax.dot_general(
            x_chunk, w,
            dimension_numbers=(((1,), (1,)), ((), ())),               # contract in_dim
            preferred_element_type=jnp.float32)

    @pl.when(k == k_tiles - 1)
    def _():
        bias = bmu_ref[...] + bsig_ref[...] * beps_ref[...]           # (s_blk, tn)
        o_ref[...] = (acc_ref[...] + bias[:, None, :]).astype(o_ref.dtype)


def bayesian_regressor_forward(x, weight_mu, weight_rho, bias_mu, bias_rho,
                               *, seed, num_samples=1, matmul_dtype=jnp.float32):
    """Stochastic forward of BayesianRegressor.

    Returns (num_samples, batch, output_dim); the torch module's forward(x)
    corresponds to num_samples=1 -> result[0].  Set matmul_dtype=jnp.bfloat16 on
    v6e/v7x for MXU-peak matmuls (f32 accumulation is kept either way).
    """
    batch, in_dim = x.shape
    out_dim, in_dim_w = weight_mu.shape
    assert in_dim_w == in_dim

    f32 = jnp.float32

    # ---- sample-invariant precompute, hoisted out of the kernel ------------------
    sigma_w = _stable_softplus(weight_rho.astype(f32))               # (out, in)
    sigma_b = _stable_softplus(bias_rho.astype(f32))                 # (out,)

    # eps via the standard JAX PRNG: deterministic given `seed`, tiling-independent.
    key = jax.random.PRNGKey(seed)
    kw, kb = jax.random.split(key)
    eps_w = jax.random.normal(kw, (num_samples, out_dim, in_dim), dtype=f32)
    eps_b = jax.random.normal(kb, (num_samples, out_dim), dtype=f32)

    # ---- tiling ------------------------------------------------------------------
    tm = min(128, _round_up(batch, 8))
    tn = min(256, _round_up(out_dim, 128))
    tk = min(256, _round_up(in_dim, 128))
    b_pad = _round_up(batch, tm)
    n_pad = _round_up(out_dim, tn)
    k_pad = _round_up(in_dim, tk)

    s_blk = min(8, num_samples)
    s_pad = _round_up(num_samples, s_blk)

    # Keep x fully resident along K unless that would blow the VMEM budget.
    x_resident = (tm * k_pad * 4) <= (4 * 1024 * 1024)

    # ---- padding (sigma/eps padded with zeros => padded weights are exactly 0) ----
    x_p = jnp.pad(x.astype(f32), ((0, b_pad - batch), (0, k_pad - in_dim)))
    wmu_p = jnp.pad(weight_mu.astype(f32), ((0, n_pad - out_dim), (0, k_pad - in_dim)))
    wsig_p = jnp.pad(sigma_w, ((0, n_pad - out_dim), (0, k_pad - in_dim)))
    weps_p = jnp.pad(eps_w, ((0, s_pad - num_samples), (0, n_pad - out_dim),
                             (0, k_pad - in_dim)))
    bmu_p = jnp.pad(bias_mu.astype(f32).reshape(1, out_dim), ((0, 0), (0, n_pad - out_dim)))
    bsig_p = jnp.pad(sigma_b.reshape(1, out_dim), ((0, 0), (0, n_pad - out_dim)))
    beps_p = jnp.pad(eps_b, ((0, s_pad - num_samples), (0, n_pad - out_dim)))

    grid = (s_pad // s_blk, b_pad // tm, n_pad // tn, k_pad // tk)

    x_spec = (pl.BlockSpec((tm, k_pad), lambda sb, m, n, k: (m, 0)) if x_resident
              else pl.BlockSpec((tm, tk), lambda sb, m, n, k: (m, k)))

    flops = 2 * s_pad * b_pad * n_pad * k_pad
    bytes_accessed = 4 * (x_p.size + wmu_p.size + wsig_p.size + weps_p.size
                          + bmu_p.size + bsig_p.size + beps_p.size
                          + s_pad * b_pad * n_pad)

    kernel = functools.partial(_bayes_linear_kernel, s_blk=s_blk, tk=tk,
                               x_resident=x_resident, mm_dtype=matmul_dtype)

    y_pad = pl.pallas_call(
        kernel,
        out_shape=jax.ShapeDtypeStruct((s_pad, b_pad, n_pad), f32),
        grid_spec=pltpu.PrefetchScalarGridSpec(
            num_scalar_prefetch=0,
            grid=grid,
            in_specs=[
                x_spec,                                                      # x
                pl.BlockSpec((tn, tk), lambda sb, m, n, k: (n, k)),          # weight_mu
                pl.BlockSpec((tn, tk), lambda sb, m, n, k: (n, k)),          # sigma_W
                pl.BlockSpec((s_blk, tn, tk), lambda sb, m, n, k: (sb, n, k)),  # eps_W
                pl.BlockSpec((1, tn), lambda sb, m, n, k: (0, n)),           # bias_mu
                pl.BlockSpec((1, tn), lambda sb, m, n, k: (0, n)),           # sigma_b
                pl.BlockSpec((s_blk, tn), lambda sb, m, n, k: (sb, n)),      # eps_b
            ],
            out_specs=pl.BlockSpec((s_blk, tm, tn), lambda sb, m, n, k: (sb, m, n)),
            scratch_shapes=[pltpu.VMEM((s_blk, tm, tn), jnp.float32)],
        ),
        compiler_params=pltpu.CompilerParams(
            dimension_semantics=("parallel", "parallel", "parallel", "arbitrary"),
            vmem_limit_bytes=32 * 1024 * 1024,
        ),
        cost_estimate=pl.CostEstimate(flops=flops, transcendentals=0,
                                      bytes_accessed=bytes_accessed),
    )(x_p, wmu_p, wsig_p, weps_p, bmu_p, bsig_p, beps_p)

    return y_pad[:num_samples, :batch, :out_dim]


if __name__ == "__main__":
    # Small shapes consistent with the module: input_dim=16, output_dim=32, batch=8.
    batch, input_dim, output_dim = 8, 16, 32

    key = jax.random.PRNGKey(0)
    k_x, k_wmu, k_bmu = jax.random.split(key, 3)

    x = jax.random.normal(k_x, (batch, input_dim), dtype=jnp.float32)
    weight_mu = 0.1 * jax.random.normal(k_wmu, (output_dim, input_dim), dtype=jnp.float32)
    bias_mu = 0.1 * jax.random.normal(k_bmu, (output_dim,), dtype=jnp.float32)

    y_det = x @ weight_mu.T + bias_mu   # deterministic linear reference (sigma -> 0)

    # --- Check 1: sigma ~ 0 (rho very negative) must reproduce the plain linear layer.
    rho_tiny_w = jnp.full((output_dim, input_dim), -40.0, jnp.float32)
    rho_tiny_b = jnp.full((output_dim,), -40.0, jnp.float32)
    y0 = bayesian_regressor_forward(x, weight_mu, rho_tiny_w, bias_mu, rho_tiny_b,
                                    seed=0, num_samples=1)
    y0 = jax.block_until_ready(y0)
    assert y0.shape == (1, batch, output_dim)
    assert jnp.allclose(y0[0], y_det, atol=1e-5, rtol=1e-5)

    # --- Check 2: stochastic samples -- determinism given seed + moment sanity.
    weight_rho = jnp.full((output_dim, input_dim), -3.0, jnp.float32)
    bias_rho = jnp.full((output_dim,), -3.0, jnp.float32)
    S = 128
    ys = bayesian_regressor_forward(x, weight_mu, weight_rho, bias_mu, bias_rho,
                                    seed=1234, num_samples=S)
    ys = jax.block_until_ready(ys)
    ys2 = bayesian_regressor_forward(x, weight_mu, weight_rho, bias_mu, bias_rho,
                                     seed=1234, num_samples=S)
    ys2 = jax.block_until_ready(ys2)
    assert ys.shape == (S, batch, output_dim)
    assert bool(jnp.array_equal(ys, ys2))           # deterministic given the seed
    assert bool(jnp.all(jnp.isfinite(ys)))

    sigma = float(jnp.log1p(jnp.exp(jnp.float32(-3.0))))                     # softplus(-3)
    exp_std = sigma * jnp.sqrt(jnp.sum(x * x, axis=1, keepdims=True) + 1.0)  # (batch, 1)
    mean_err = jnp.abs(ys.mean(axis=0) - y_det)
    assert bool(jnp.all(mean_err < 8.0 * exp_std / (S ** 0.5)))
    std_ratio = jnp.std(ys, axis=0) / exp_std
    assert bool(jnp.all((std_ratio > 0.5) & (std_ratio < 2.0)))

    # --- Check 3: stable softplus must not overflow for large rho.
    rho_big_w = jnp.full((output_dim, input_dim), 100.0, jnp.float32)
    rho_big_b = jnp.full((output_dim,), 100.0, jnp.float32)
    y_big = bayesian_regressor_forward(x, weight_mu, rho_big_w, bias_mu, rho_big_b,
                                       seed=7, num_samples=1)
    assert bool(jnp.all(jnp.isfinite(jax.block_until_ready(y_big))))

    # --- Check 4: bf16 matmul operands (v6e/v7x fast path) still match at loose tol.
    y_bf16 = bayesian_regressor_forward(x, weight_mu, rho_tiny_w, bias_mu, rho_tiny_b,
                                        seed=0, num_samples=1,
                                        matmul_dtype=jnp.bfloat16)
    y_bf16 = jax.block_until_ready(y_bf16)
    assert jnp.allclose(y_bf16[0], y_det, atol=5e-2, rtol=5e-2)

    print("KERNEL_OK")
</pallas_src>

<mosaic_0001>
module attributes {stable_mosaic.version = 11 : i64} {
  func.func @_bayes_linear_kernel(%arg0: i32, %arg1: i32, %arg2: i32, %arg3: i32, %arg4: memref<8x128xf32, #tpu.memory_space<vmem>>, %arg5: memref<128x128xf32, #tpu.memory_space<vmem>>, %arg6: memref<128x128xf32, #tpu.memory_space<vmem>>, %arg7: memref<1x128x128xf32, #tpu.memory_space<vmem>>, %arg8: memref<1x128xf32, #tpu.memory_space<vmem>>, %arg9: memref<1x128xf32, #tpu.memory_space<vmem>>, %arg10: memref<1x128xf32, #tpu.memory_space<vmem>>, %arg11: memref<1x8x128xf32, #tpu.memory_space<vmem>>, %arg12: memref<1x8x128xf32, #tpu.memory_space<vmem>>) attributes {dimension_semantics = [#tpu.dimension_semantics<parallel>, #tpu.dimension_semantics<parallel>, #tpu.dimension_semantics<parallel>, #tpu.dimension_semantics<arbitrary>], iteration_bounds = array<i64: 1, 1, 1, 1>, scalar_prefetch = 0 : i64, scratch_operands = 1 : i64, tpu.core_type = #tpu.core_type<tc>, window_params = [{transform_indices = @transform_0, window_bounds = array<i64: 8, 128>}, {transform_indices = @transform_1, window_bounds = array<i64: 128, 128>}, {transform_indices = @transform_2, window_bounds = array<i64: 128, 128>}, {transform_indices = @transform_3, window_bounds = array<i64: 1, 128, 128>}, {transform_indices = @transform_4, window_bounds = array<i64: 1, 128>}, {transform_indices = @transform_5, window_bounds = array<i64: 1, 128>}, {transform_indices = @transform_6, window_bounds = array<i64: 1, 128>}, {transform_indices = @transform_7, window_bounds = array<i64: 1, 8, 128>}]} {
    %c0_i32 = arith.constant 0 : i32
    %0 = arith.cmpi eq, %arg3, %c0_i32 : i32
    %1 = arith.extui %0 : i1 to i32
    %c0_i32_0 = arith.constant 0 : i32
    %2 = arith.cmpi ne, %1, %c0_i32_0 : i32
    scf.if %2 {
      %cst_16 = arith.constant 0.000000e+00 : f32
      %22 = vector.broadcast %cst_16 : f32 to vector<1x8x128xf32>
      %c0_17 = arith.constant 0 : index
      %c0_18 = arith.constant 0 : index
      %c0_19 = arith.constant 0 : index
      %23 = vector.load %arg12[%c0_17, %c0_18, %c0_19] : memref<1x8x128xf32, #tpu.memory_space<vmem>>, vector<1x8x128xf32>
      tpu.vector_store %arg12[%c0_17, %c0_18, %c0_19], %22 {strides = array<i32>} : memref<1x8x128xf32, #tpu.memory_space<vmem>>, vector<1x8x128xf32>,
    } else {
    }
    %c128_i32 = arith.constant 128 : i32
    %3 = arith.muli %arg3, %c128_i32 : i32
    %c0 = arith.constant 0 : index
    %4 = arith.index_cast %3 : i32 to index
    %5 = vector.load %arg4[%c0, %4] : memref<8x128xf32, #tpu.memory_space<vmem>>, vector<8x128xf32>
    %c0_1 = arith.constant 0 : index
    %c0_2 = arith.constant 0 : index
    %6 = vector.load %arg5[%c0_1, %c0_2] : memref<128x128xf32, #tpu.memory_space<vmem>>, vector<128x128xf32>
    %c0_3 = arith.constant 0 : index
    %c0_4 = arith.constant 0 : index
    %7 = vector.load %arg6[%c0_3, %c0_4] : memref<128x128xf32, #tpu.memory_space<vmem>>, vector<128x128xf32>
    %c0_5 = arith.constant 0 : index
    %c0_6 = arith.constant 0 : index
    %c0_7 = arith.constant 0 : index
    %8 = vector.load %arg7[%c0_5, %c0_6, %c0_7] : memref<1x128x128xf32, #tpu.memory_space<vmem>>, vector<1x128x128xf32>
    %9 = vector.shape_cast %8 : vector<1x128x128xf32> to vector<128x128xf32>
    %10 = arith.mulf %7, %9 : vector<128x128xf32>
    %11 = arith.addf %6, %10 : vector<128x128xf32>
    %c0_8 = arith.constant 0 : index
    %c0_9 = arith.constant 0 : index
    %c0_10 = arith.constant 0 : index
    %12 = vector.load %arg12[%c0_8, %c0_9, %c0_10] : memref<1x8x128xf32, #tpu.memory_space<vmem>>, vector<1x8x128xf32>
    %13 = vector.shape_cast %12 : vector<1x8x128xf32> to vector<8x128xf32>
    %cst = arith.constant dense<0.000000e+00> : vector<8x128xf32>
    %14 = tpu.matmul %5, %11, %cst {dimension_numbers = #tpu.dot_dimension_numbers<[1], [1], [0], [0], [0, 0, 1, 0], [], []>} : vector<8x128xf32>, vector<128x128xf32>, vector<8x128xf32> -> vector<8x128xf32>
    %15 = arith.addf %13, %14 : vector<8x128xf32>
    %c0_11 = arith.constant 0 : index
    %c0_12 = arith.constant 0 : index
    %c0_13 = arith.constant 0 : index
    %16 = vector.load %arg12[%c0_11, %c0_12, %c0_13] : memref<1x8x128xf32, #tpu.memory_space<vmem>>, vector<1x8x128xf32>
    %17 = vector.shape_cast %16 : vector<1x8x128xf32> to vector<8x128xf32>
    %18 = vector.shape_cast %15 : vector<8x128xf32> to vector<1x8x128xf32>
    tpu.vector_store %arg12[%c0_11, %c0_12, %c0_13], %18 {strides = array<i32>} : memref<1x8x128xf32, #tpu.memory_space<vmem>>, vector<1x8x128xf32>,
    %c0_i32_14 = arith.constant 0 : i32
    %19 = arith.cmpi eq, %arg3, %c0_i32_14 : i32
    %20 = arith.extui %19 : i1 to i32
    %c0_i32_15 = arith.constant 0 : i32
    %21 = arith.cmpi ne, %20, %c0_i32_15 : i32
    scf.if %21 {
      %c0_16 = arith.constant 0 : index
      %c0_17 = arith.constant 0 : index
      %22 = vector.load %arg8[%c0_16, %c0_17] : memref<1x128xf32, #tpu.memory_space<vmem>>, vector<1x128xf32>
      %c0_18 = arith.constant 0 : index
      %c0_19 = arith.constant 0 : index
      %23 = vector.load %arg9[%c0_18, %c0_19] : memref<1x128xf32, #tpu.memory_space<vmem>>, vector<1x128xf32>
      %c0_20 = arith.constant 0 : index
      %c0_21 = arith.constant 0 : index
      %24 = vector.load %arg10[%c0_20, %c0_21] : memref<1x128xf32, #tpu.memory_space<vmem>>, vector<1x128xf32>
      %25 = arith.mulf %23, %24 : vector<1x128xf32>
      %26 = arith.addf %22, %25 : vector<1x128xf32>
      %c0_22 = arith.constant 0 : index
      %c0_23 = arith.constant 0 : index
      %c0_24 = arith.constant 0 : index
      %27 = vector.load %arg12[%c0_22, %c0_23, %c0_24] : memref<1x8x128xf32, #tpu.memory_space<vmem>>, vector<1x8x128xf32>
      %28 = vector.shape_cast %26 : vector<1x128xf32> to vector<1x1x128xf32>
      %29 = vector.broadcast %28 : vector<1x1x128xf32> to vector<1x8x128xf32>
      %30 = arith.addf %27, %29 : vector<1x8x128xf32>
      %c0_25 = arith.constant 0 : index
      %c0_26 = arith.constant 0 : index
      %c0_27 = arith.constant 0 : index
      %31 = vector.load %arg11[%c0_25, %c0_26, %c0_27] : memref<1x8x128xf32, #tpu.memory_space<vmem>>, vector<1x8x128xf32>
      tpu.vector_store %arg11[%c0_25, %c0_26, %c0_27], %30 {strides = array<i32>} : memref<1x8x128xf32, #tpu.memory_space<vmem>>, vector<1x8x128xf32>,
    } else {
    }
    return
  }
  func.func @transform_0(%arg0: i32, %arg1: i32, %arg2: i32, %arg3: i32) -> (i32, i32) {
    %c0_i32 = arith.constant 0 : i32
    %c0_i32_0 = arith.constant 0 : i32
    return %arg1, %c0_i32 : i32, i32
  }
  func.func @transform_1(%arg0: i32, %arg1: i32, %arg2: i32, %arg3: i32) -> (i32, i32) {
    %c0_i32 = arith.constant 0 : i32
    return %arg2, %arg3 : i32, i32
  }
  func.func @transform_2(%arg0: i32, %arg1: i32, %arg2: i32, %arg3: i32) -> (i32, i32) {
    %c0_i32 = arith.constant 0 : i32
    return %arg2, %arg3 : i32, i32
  }
  func.func @transform_3(%arg0: i32, %arg1: i32, %arg2: i32, %arg3: i32) -> (i32, i32, i32) {
    %c0_i32 = arith.constant 0 : i32
    return %arg0, %arg2, %arg3 : i32, i32, i32
  }
  func.func @transform_4(%arg0: i32, %arg1: i32, %arg2: i32, %arg3: i32) -> (i32, i32) {
    %c0_i32 = arith.constant 0 : i32
    %c0_i32_0 = arith.constant 0 : i32
    return %c0_i32, %arg2 : i32, i32
  }
  func.func @transform_5(%arg0: i32, %arg1: i32, %arg2: i32, %arg3: i32) -> (i32, i32) {
    %c0_i32 = arith.constant 0 : i32
    %c0_i32_0 = arith.constant 0 : i32
    return %c0_i32, %arg2 : i32, i32
  }
  func.func @transform_6(%arg0: i32, %arg1: i32, %arg2: i32, %arg3: i32) -> (i32, i32) {
    %c0_i32 = arith.constant 0 : i32
    return %arg0, %arg2 : i32, i32
  }
  func.func @transform_7(%arg0: i32, %arg1: i32, %arg2: i32, %arg3: i32) -> (i32, i32, i32) {
    %c0_i32 = arith.constant 0 : i32
    return %arg0, %arg1, %arg2 : i32, i32, i32
  }
}

</mosaic_0001>

<bundles_post_ra>
// kernel: tpu_custom_call.1
= control target key start
LH: loop header
LB: loop body
LE: loop exit
PB: predicated region body
PF: predicated region fallthrough
CT: control target
= control target key end

     0   :  { %12 = vsyncpa [#allocation4], 0  ;;  %s618_s0 = inlined_call_operand.hbm [shape: f32[8,128], index: 0, kind: input, shape index: {}]   ;;  %s619_s1 = inlined_call_operand.hbm [shape: f32[128,128], index: 1, kind: input, shape index: {}]   ;;  %s620_s2 = inlined_call_operand.hbm [shape: f32[128,128], index: 2, kind: input, shape index: {}]   ;;  %s621_s3 = inlined_call_operand.hbm [shape: f32[1,128,128], index: 3, kind: input, shape index: {}]   ;;  %s622_s4 = inlined_call_operand.vmem [shape: f32[1,128], index: 4, kind: input, shape index: {}]   ;;  %s623_s5 = inlined_call_operand.vmem [shape: f32[1,128], index: 5, kind: input, shape index: {}]   ;;  %s624_s6 = inlined_call_operand.vmem [shape: f32[1,128], index: 6, kind: input, shape index: {}]   ;;  %s625_s7 = inlined_call_operand.hbm [shape: f32[1,8,128], index: 7, kind: output, shape index: {}]  }
   0x1   :  { %13 = vsyncpa [#allocation7], 0 }
   0x2   :  { %14 = vsyncpa [#allocation10], 0 }
   0x3   :  { %15 = vsyncpa [#allocation5], 0  ;;  %s482_s24 = smov [#allocation6]   ;;  %s364_s28 = scalar_lea.hbm %s619_s1, 2048 }
   0x4   :  { %s31_s25 = sshll.u32 %s482_s24, 4  ;;  %p365_p0 = scmp.ne.s32.totalorder %s619_s1, %s364_s28  ;;  %s32_s25 = int_to_ptr.vmem [resolvable:$true] %s31_s25 }
   0x5   :  { %p368_p1 = scmp.lt.u32.totalorder %s364_s28, %s619_s1 }
   0x7   :  { %p370_p2 = pnand %p368_p1, %p365_p0 }
   0x9   :  { %373 = shalt.err (!%p370_p2)
}
   0xa   :  { %s374_s10 = scalar_lea.vmem %s32_s25, 2048  ;;  %p379_p4 = scmp.lt.s32.totalorder %s32_s25, %s32_s25 }
   0xb   :  { %p375_p3 = scmp.ne.s32.totalorder %s32_s25, %s374_s10  ;;  %p380_p5 = scmp.lt.s32.totalorder %s374_s10, %s374_s10 }
   0xd   :  { %p381_p6 = por %p380_p5, %p379_p4 }
   0xf   :  { %p382_p7 = pnand %p381_p6, %p375_p3 }
  0x11   :  { %385 = shalt.err (!%p382_p7)
}
  0x12   :  { %s483_s11 = smov 128   ;;  %s484_s12 = smov 8  }
  0x13   :  { %37 = dma.hbm_to_vmem [thread:$0]  %s619_s1, 2048, %s32_s25, [#allocation7], %s483_s11, %s483_s11, %s484_s12  }
  0x14   :  { %s485_s15 = smov [#allocation3]   ;;  %s486_s17 = smov [#allocation8]  }
  0x15   :  { %s22_s16 = sshll.u32 %s485_s15, 4  ;;  %s43_s18 = sshll.u32 %s486_s17, 4  ;;  %s23_s16 = int_to_ptr.vmem [resolvable:$true] %s22_s16  ;;  %s44_s18 = int_to_ptr.vmem [resolvable:$true] %s43_s18 }
  0x16   :  { %s386_s21 = scalar_lea.hbm %s618_s0, 128 }
  0x17   :  { %p387_p8 = scmp.ne.s32.totalorder %s618_s0, %s386_s21  ;;  %p390_p9 = scmp.lt.u32.totalorder %s386_s21, %s618_s0 }
  0x19   :  { %p392_p10 = pnand %p390_p9, %p387_p8 }
  0x1b   :  { %395 = shalt.err (!%p392_p10)
}
  0x1c   :  { %s396_s1 = scalar_lea.vmem %s23_s16, 128  ;;  %p401_p12 = scmp.lt.s32.totalorder %s23_s16, %s23_s16 }
  0x1d   :  { %p397_p11 = scmp.ne.s32.totalorder %s23_s16, %s396_s1  ;;  %p402_p13 = scmp.lt.s32.totalorder %s396_s1, %s396_s1 }
  0x1f   :  { %p403_p0 = por %p402_p13, %p401_p12 }
  0x21   :  { %p404_p1 = pnand %p403_p0, %p397_p11 }
  0x23   :  { %407 = shalt.err (!%p404_p1)
}
  0x24   :  { %25 = dma.hbm_to_vmem [thread:$0]  %s618_s0, 128, %s23_s16, [#allocation4]  }
  0x25   :  { %s408_s30 = scalar_lea.hbm %s620_s2, 2048 }
  0x26   :  { %p409_p2 = scmp.ne.s32.totalorder %s620_s2, %s408_s30  ;;  %p412_p3 = scmp.lt.u32.totalorder %s408_s30, %s620_s2 }
  0x28   :  { %p414_p4 = pnand %p412_p3, %p409_p2 }
  0x2a   :  { %417 = shalt.err (!%p414_p4)
}
  0x2b   :  { %s418_s14 = scalar_lea.vmem %s44_s18, 2048  ;;  %p423_p6 = scmp.lt.s32.totalorder %s44_s18, %s44_s18 }
  0x2c   :  { %p419_p5 = scmp.ne.s32.totalorder %s44_s18, %s418_s14  ;;  %p424_p7 = scmp.lt.s32.totalorder %s418_s14, %s418_s14 }
  0x2e   :  { %p425_p8 = por %p424_p7, %p423_p6 }
  0x30   :  { %p426_p9 = pnand %p425_p8, %p419_p5 }
  0x32   :  { %429 = shalt.err (!%p426_p9)
}
  0x33   :  { %49 = dma.hbm_to_vmem [thread:$0]  %s620_s2, 2048, %s44_s18, [#allocation7], %s483_s11, %s483_s11, %s484_s12  }
  0x34   :  { %s487_s16 = smov [#allocation9]   ;;  %s430_s21 = scalar_lea.hbm %s621_s3, 2048 }
  0x35   :  { %s55_s17 = sshll.u32 %s487_s16, 4  ;;  %p431_p10 = scmp.ne.s32.totalorder %s621_s3, %s430_s21  ;;  %s56_s17 = int_to_ptr.vmem [resolvable:$true] %s55_s17 }
  0x36   :  { %p434_p11 = scmp.lt.u32.totalorder %s430_s21, %s621_s3 }
  0x38   :  { %p436_p12 = pnand %p434_p11, %p431_p10 }
  0x3a   :  { %439 = shalt.err (!%p436_p12)
}
  0x3b   :  { %s440_s1 = scalar_lea.vmem %s56_s17, 2048  ;;  %p445_p0 = scmp.lt.s32.totalorder %s56_s17, %s56_s17 }
  0x3c   :  { %p441_p13 = scmp.ne.s32.totalorder %s56_s17, %s440_s1  ;;  %p446_p1 = scmp.lt.s32.totalorder %s440_s1, %s440_s1 }
  0x3e   :  { %p447_p2 = por %p446_p1, %p445_p0 }
  0x40   :  { %p448_p3 = pnand %p447_p2, %p441_p13 }
  0x42   :  { %451 = shalt.err (!%p448_p3)
}
  0x43   :  { %61 = dma.hbm_to_vmem [thread:$0]  %s621_s3, 2048, %s56_s17, [#allocation10], %s483_s11, %s483_s11, %s484_s12  }
  0x44   :  { %474 = dma.done.wait [#allocation4], 128  }
  0x45   :  { %475 = vsyncadd [#allocation4], 4294967168 }
  0x46   :  { %476 = dma.done.wait [#allocation7], 4096  }
  0x47   :  { %477 = vsyncadd [#allocation7], 4294963200 }
  0x48   :  { %478 = dma.done.wait [#allocation10], 2048  }
  0x49   :  { %479 = vsyncadd [#allocation10], 4294965248  ;;  %v488_v0 = vmov 0.0|0.0   ;;  %vm489_vm0 = vmmov 0   ;;  %v490_v1 = vmov 0.0   ;;  %v90_v2 = vld [vmem:[#allocation6] sm:$0xff] }
  0x4a   :  { %330 = vmatprep.subr.bf16.mxu0 %v488_v0  ;;  %327 = vmatprep.mubr.msk.f32.mxu0 %vm489_vm0, %v490_v1  ;;  %v91_v3 = vld [vmem:[#allocation6 + $0x8] sm:$0xff]  ;;  %v106_v4 = vld [vmem:[#allocation8] sm:$0xff]  ;;  %v108_v10 = vld [vmem:[#allocation8 + $0x10] sm:$0xff]  ;;  %s491_s29 = smov [#allocation11]  }
  0x4b   :  { %v107_v5 = vld [vmem:[#allocation8 + $0x8] sm:$0xff]  ;;  %v122_v6 = vld [vmem:[#allocation9] sm:$0xff]  ;;  %v109_v11 = vld [vmem:[#allocation8 + $0x18] sm:$0xff]  ;;  %s266_s30 = sshll.u32 %s491_s29, 4  ;;  %s267_s30 = int_to_ptr.vmem [resolvable:$true] %s266_s30 }
  0x4c   :  { %v123_v7 = vld [vmem:[#allocation9 + $0x8] sm:$0xff]  ;;  %v138_v8 = vmul.f32 %v122_v6, %v106_v4  ;;  %v124_v12 = vld [vmem:[#allocation9 + $0x10] sm:$0xff]  ;;  %v125_v13 = vld [vmem:[#allocation9 + $0x18] sm:$0xff]  ;;  %p457_p5 = scmp.lt.s32.totalorder %s267_s30, %s267_s30 }
  0x4d   :  { %v139_v9 = vmul.f32 %v123_v7, %v107_v5  ;;  %v140_v16 = vmul.f32 %v124_v12, %v108_v10  ;;  %v141_v17 = vmul.f32 %v125_v13, %v109_v11  ;;  %v92_v18 = vld [vmem:[#allocation6 + $0x10] sm:$0xff]  ;;  %v93_v19 = vld [vmem:[#allocation6 + $0x18] sm:$0xff]  ;;  %v110_v23 = vld [vmem:[#allocation8 + $0x20] sm:$0xff] }
  0x4e   :  { %v154_v14 = vadd.f32 %v138_v8, %v90_v2  ;;  %v111_v24 = vld [vmem:[#allocation8 + $0x28] sm:$0xff]  ;;  %v126_v25 = vld [vmem:[#allocation9 + $0x20] sm:$0xff]  ;;  %v112_v34 = vld [vmem:[#allocation8 + $0x30] sm:$0xff] }
  0x4f   :  { %v155_v15 = vadd.f32 %v139_v9, %v91_v3  ;;  %v156_v21 = vadd.f32 %v140_v16, %v92_v18  ;;  %v157_v22 = vadd.f32 %v141_v17, %v93_v19  ;;  %v127_v26 = vld [vmem:[#allocation9 + $0x28] sm:$0xff]  ;;  %v142_v28 = vmul.f32 %v126_v25, %v110_v23  ;;  %v94_v30 = vld [vmem:[#allocation6 + $0x20] sm:$0xff]  ;;  %v113_v35 = vld [vmem:[#allocation8 + $0x38] sm:$0xff] }
  0x50   :  { %v143_v29 = vmul.f32 %v127_v26, %v111_v24  ;;  %v95_v31 = vld [vmem:[#allocation6 + $0x28] sm:$0xff]  ;;  %v128_v36 = vld [vmem:[#allocation9 + $0x30] sm:$0xff]  ;;  %v129_v37 = vld [vmem:[#allocation9 + $0x38] sm:$0xff] }
  0x51   :  { %v331_v20 = vpack.c.bf16 %v155_v15, %v154_v14  ;;  %v334_v27 = vpack.c.bf16 %v157_v22, %v156_v21  ;;  %v158_v32 = vadd.f32 %v142_v28, %v94_v30  ;;  %v144_v39 = vmul.f32 %v128_v36, %v112_v34  ;;  %v96_v41 = vld [vmem:[#allocation6 + $0x30] sm:$0xff]  ;;  %v97_v42 = vld [vmem:[#allocation6 + $0x38] sm:$0xff]  ;;  %v114_v45 = vld [vmem:[#allocation8 + $0x40] sm:$0xff] }
  0x52   :  { %v159_v33 = vadd.f32 %v143_v29, %v95_v31  ;;  %v145_v40 = vmul.f32 %v129_v37, %v113_v35  ;;  %v115_v46 = vld [vmem:[#allocation8 + $0x48] sm:$0xff]  ;;  %v130_v47 = vld [vmem:[#allocation9 + $0x40] sm:$0xff]  ;;  %v116_v56 = vld [vmem:[#allocation8 + $0x50] sm:$0xff]  ;;  %v253_v28 = vlaneseq }
  0x53   :  { %332 = vmatpush3.bf16.xpose.msra.mxu0 %v331_v20  ;;  %v160_v43 = vadd.f32 %v144_v39, %v96_v41  ;;  %v131_v48 = vld [vmem:[#allocation9 + $0x48] sm:$0xff]  ;;  %v146_v50 = vmul.f32 %v130_v47, %v114_v45  ;;  %v98_v52 = vld [vmem:[#allocation6 + $0x40] sm:$0xff]  ;;  %v117_v57 = vld [vmem:[#allocation8 + $0x58] sm:$0xff] }
  0x54   :  { %333 = vmatprep.subr.bf16.mxu0 %v488_v0  ;;  %v337_v38 = vpack.c.bf16 %v159_v33, %v158_v32  ;;  %v161_v44 = vadd.f32 %v145_v40, %v97_v42  ;;  %v147_v51 = vmul.f32 %v131_v48, %v115_v46  ;;  %v99_v53 = vld [vmem:[#allocation6 + $0x48] sm:$0xff]  ;;  %v132_v58 = vld [vmem:[#allocation9 + $0x50] sm:$0xff]  ;;  %v133_v59 = vld [vmem:[#allocation9 + $0x58] sm:$0xff]  ;;  %v254_v32 = vshrl.u32 %v253_v28, 7 }
  0x55   :  { %v162_v54 = vadd.f32 %v146_v50, %v98_v52  ;;  %v148_v61 = vmul.f32 %v132_v58, %v116_v56  ;;  %v149_v62 = vmul.f32 %v133_v59, %v117_v57  ;;  %v100_v63 = vld [vmem:[#allocation6 + $0x50] sm:$0xff]  ;;  %v101_v1 = vld [vmem:[#allocation6 + $0x58] sm:$0xff]  ;;  %v118_v4 = vld [vmem:[#allocation8 + $0x60] sm:$0xff] }
  0x56   :  { %v340_v49 = vpack.c.bf16 %v161_v44, %v160_v43  ;;  %v163_v55 = vadd.f32 %v147_v51, %v99_v53  ;;  %v119_v5 = vld [vmem:[#allocation8 + $0x68] sm:$0xff]  ;;  %v134_v6 = vld [vmem:[#allocation9 + $0x60] sm:$0xff]  ;;  %v120_v15 = vld [vmem:[#allocation8 + $0x70] sm:$0xff]  ;;  %v255_v34 = vsub.s32 0, %v254_v32 }
  0x57   :  { %v164_v2 = vadd.f32 %v148_v61, %v100_v63  ;;  %v165_v3 = vadd.f32 %v149_v62, %v101_v1  ;;  %v135_v7 = vld [vmem:[#allocation9 + $0x68] sm:$0xff]  ;;  %v150_v9 = vmul.f32 %v134_v6, %v118_v4  ;;  %v102_v11 = vld [vmem:[#allocation6 + $0x60] sm:$0xff]  ;;  %v121_v16 = vld [vmem:[#allocation8 + $0x78] sm:$0xff] }
  0x58   :  { %v343_v60 = vpack.c.bf16 %v163_v55, %v162_v54  ;;  %v151_v10 = vmul.f32 %v135_v7, %v119_v5  ;;  %v103_v12 = vld [vmem:[#allocation6 + $0x68] sm:$0xff]  ;;  %v136_v17 = vld [vmem:[#allocation9 + $0x70] sm:$0xff]  ;;  %v137_v18 = vld [vmem:[#allocation9 + $0x78] sm:$0xff] }
  0x59   :  { %v346_v8 = vpack.c.bf16 %v165_v3, %v164_v2  ;;  %v166_v13 = vadd.f32 %v150_v9, %v102_v11  ;;  %v152_v20 = vmul.f32 %v136_v17, %v120_v15  ;;  %v153_v21 = vmul.f32 %v137_v18, %v121_v16  ;;  %v104_v22 = vld [vmem:[#allocation6 + $0x70] sm:$0xff]  ;;  %v105_v23 = vld [vmem:[#allocation6 + $0x78] sm:$0xff] }
  0x5a   :  { %v167_v14 = vadd.f32 %v151_v10, %v103_v12  ;;  %v247_v29 = vld [vmem:[%s623_s5] sm:$0x1]  ;;  %s452_s5 = scalar_lea.vmem %s267_s30, 128 }
  0x5b   :  { %335 = vmatpush3.bf16.xpose.msra.mxu0 %v334_v27  ;;  %v168_v24 = vadd.f32 %v152_v20, %v104_v22  ;;  %v169_v25 = vadd.f32 %v153_v21, %v105_v23  ;;  %v89_v27 = vld [vmem:[#allocation3] sm:$0xff]  ;;  %p453_p4 = scmp.ne.s32.totalorder %s267_s30, %s452_s5  ;;  %p458_p6 = scmp.lt.s32.totalorder %s452_s5, %s452_s5 }
  0x5c   :  { %336 = vmatprep.subr.bf16.mxu0 %v488_v0  ;;  %v349_v19 = vpack.c.bf16 %v167_v14, %v166_v13  ;;  %v248_v30 = vld [vmem:[%s624_s6] sm:$0x1] }
  0x5d   :  { %v352_v26 = vpack.c.bf16 %v169_v25, %v168_v24  ;;  %v249_v31 = vmul.f32 %v248_v30, %v247_v29  ;;  %v246_v33 = vld [vmem:[%s622_s4] sm:$0x1]  ;;  %p459_p7 = por %p458_p6, %p457_p5 }
  0x5f   :  { %p460_p8 = pnand %p459_p7, %p453_p4 }
  0x63   :  { %338 = vmatpush3.bf16.xpose.msra.mxu0 %v337_v38 }
  0x64   :  { %339 = vmatprep.subr.bf16.mxu0 %v488_v0 }
  0x6b   :  { %341 = vmatpush3.bf16.xpose.msra.mxu0 %v340_v49 }
  0x6c   :  { %342 = vmatprep.subr.bf16.mxu0 %v488_v0 }
  0x73   :  { %344 = vmatpush3.bf16.xpose.msra.mxu0 %v343_v60 }
  0x74   :  { %345 = vmatprep.subr.bf16.mxu0 %v488_v0 }
  0x7b   :  { %347 = vmatpush3.bf16.xpose.msra.mxu0 %v346_v8 }
  0x7c   :  { %348 = vmatprep.subr.bf16.mxu0 %v488_v0 }
  0x83   :  { %350 = vmatpush3.bf16.xpose.msra.mxu0 %v349_v19 }
  0x84   :  { %351 = vmatprep.subr.bf16.mxu0 %v488_v0  ;;  %v250_v0 = vadd.f32 %v249_v31, %v246_v33 }
  0x86   :  { %v256_v35 = vrot.slane %v250_v0, %v255_v34 }
  0x8b   :  { %353 = vmatpush3.bf16.xpose.msra.mxu0 %v352_v26 }
  0x92   :  { %328 = vmatmul.mubr.f32.vlgmr.msra.gmra.mrb[0].mxu0 %v89_v27 }
 0x165   :  { %v237_v36 = vpop.f32.mrb[0].mxu0 }
 0x166   :  { %v258_v37 = vadd.f32 %v256_v35, %v237_v36  ;;  %v329_v38 = vpop.f32.mrb[1].mxu0 }
 0x168   :  { %259 = vst [vmem:[#allocation11] sm:$0xff] %v258_v37 }
 0x169   :  { %463 = shalt.err (!%p460_p8)
}
 0x16a   :  { %s464_s4 = scalar_lea.hbm %s625_s7, 128 }
 0x16b   :  { %p465_p9 = scmp.ne.s32.totalorder %s625_s7, %s464_s4  ;;  %p468_p10 = scmp.lt.u32.totalorder %s464_s4, %s625_s7 }
 0x16d   :  { %p470_p11 = pnand %p468_p10, %p465_p9 }
 0x16f   :  { %473 = shalt.err (!%p470_p11)
}
 0x170   :  { %269 = dma.vmem_to_hbm [thread:$0]  %s267_s30, 128, %s625_s7, [#allocation5]  }
 0x171   :  { %480 = dma.done.wait [#allocation5], 128  }
 0x172   :  { %481 = vsyncadd [#allocation5], 4294967168 }
 0x173   :  { %273 = vsyncpa [#allocation4], 1 }
 0x174   :  { %274 = vsyncpa [#allocation7], 1 }
 0x175   :  { %275 = vsyncpa [#allocation10], 1 }
 0x176   :  { %276 = vsyncpa [#allocation5], 1 }

</bundles_post_ra>
